<compile_context>
chip_gen: v6e
topology: v6e:2x2x1
jax: 0.10.0
libtpu: 0.0.40
codegen_flags: <defaults>
</compile_context>

<pallas_src>
import numpy as np
import jax
import jax.numpy as jnp
from jax import lax
from jax.experimental import pallas as pl
from jax.experimental.pallas import tpu as pltpu


# ---------------------------------------------------------------------------
# Kernels
# ---------------------------------------------------------------------------
def _hat_kernel_not_last(data_ref, w_ref, mask_ref, out_ref):
    # data_ref : [Pblk*F, E]  flattened data block (matmul-native layout)
    # w_ref    : [E, O+1]     weights with the score projection folded in as column O
    # mask_ref : [F, K]       per-softmax-layer feature masks (1.0 inside subset)
    # out_ref  : [Pblk, K*O]  lane-dense slab; out[p, k*O + o] = sum_f sm[p,f,k]*lin[p,f,o]
    rows, _ = data_ref.shape
    F, K = mask_ref.shape
    O = w_ref.shape[1] - 1
    Pblk = rows // F

    # One MXU matmul for the whole block; score comes out as the extra column.
    lin_aug = jnp.dot(data_ref[...], w_ref[...],
                      preferred_element_type=jnp.float32)        # [Pblk*F, O+1]
    lin = lin_aug[:, :O]                                          # [Pblk*F, O]
    s = lin_aug[:, O:O + 1]                                       # [Pblk*F, 1]
    a = jnp.where(s >= 0, s, 0.2 * s)                             # LeakyReLU(0.2)

    # Masked softmax over the feature axis, per softmax layer (tiny tensors).
    a3 = a.reshape(Pblk, F, 1)                                    # [Pblk, F, 1]
    m = mask_ref[...][None]                                       # [1, F, K]
    masked = jnp.where(m > 0, a3, jnp.float32(-1e30))             # [Pblk, F, K]
    mx = jnp.max(masked, axis=1, keepdims=True)                   # [Pblk, 1, K]
    e = jnp.exp(masked - mx) * m                                  # [Pblk, F, K]
    denom = jnp.maximum(jnp.sum(e, axis=1, keepdims=True),
                        jnp.float32(1e-30))                       # guard empty subsets
    sm = e / denom                                                # exact divide (tiny)

    # out[p, k, o] = sum_f sm[p,f,k] * lin[p,f,o]; K is small & static -> direct stores.
    lin3 = lin.reshape(Pblk, F, O)                                # needed for the F-reduce
    for k in range(K):
        out_ref[:, k * O:(k + 1) * O] = jnp.sum(
            lin3 * sm[:, :, k:k + 1], axis=1).astype(out_ref.dtype)


def _hat_kernel_last(data_ref, w_ref, mask_ref, out_ref):
    # is_last branch: only the first softmax layer is ever used (torch returns in-loop).
    # data_ref:[Pblk*F,E]  w_ref:[E,O+1]  mask_ref:[1,F]  out_ref:[Pblk*F,O]
    rows, _ = data_ref.shape
    F = mask_ref.shape[1]
    O = w_ref.shape[1] - 1
    Pblk = rows // F

    lin_aug = jnp.dot(data_ref[...], w_ref[...],
                      preferred_element_type=jnp.float32)         # [Pblk*F, O+1]
    lin = lin_aug[:, :O]                                          # stays MXU-native
    s = lin_aug[:, O:O + 1]                                       # [Pblk*F, 1]
    a = jnp.where(s >= 0, s, 0.2 * s)                             # LeakyReLU(0.2)

    a2 = a.reshape(Pblk, F)                                       # tiny relayout
    m = mask_ref[...]                                             # [1, F]
    masked = jnp.where(m > 0, a2, jnp.float32(-1e30))             # [Pblk, F]
    mx = jnp.max(masked, axis=1, keepdims=True)
    e = jnp.exp(masked - mx) * m
    denom = jnp.maximum(jnp.sum(e, axis=1, keepdims=True), jnp.float32(1e-30))
    sm = (e / denom).reshape(rows, 1)                             # [Pblk*F, 1]

    # No [Pblk,F,O] -> [Pblk,F*O] relayout: store in the matmul's native layout.
    out_ref[...] = (lin * sm).astype(out_ref.dtype)               # [Pblk*F, O]


# ---------------------------------------------------------------------------
# Block / grid planning (generation-aware)
# ---------------------------------------------------------------------------
def _is_v7x():
    try:
        kind = jax.devices()[0].device_kind.lower()
    except Exception:
        return False
    return ("v7" in kind) or ("tpu7" in kind)


def _plan_p_blocks(P, p_block=None):
    """Return (p_block, p_pad, nsteps)."""
    if p_block is not None:
        p_pad = -(-P // p_block) * p_block
        return p_block, p_pad, p_pad // p_block
    if _is_v7x():
        # 2 TensorCores/chip: always emit >=2 "parallel" grid steps so both cores are
        # fed; pad P to a multiple of 16 so per-step output rows stay a multiple of 8.
        p_pad = -(-max(P, 16) // 16) * 16
        p_block = min(p_pad // 2, 512)          # cap rows: v7x VMEM is 64 MiB physical
        p_pad = -(-p_pad // p_block) * p_block
    else:
        # v5e/v6e: 1 TensorCore -> extra grid steps are pure ~0.35us/step overhead.
        p_block = min(P, 1024)                  # cap keeps large-P data blocks in VMEM
        p_pad = -(-P // p_block) * p_block
    return p_block, p_pad, p_pad // p_block


# ---------------------------------------------------------------------------
# Wrapper
# ---------------------------------------------------------------------------
def hat_layer_forward(data, w_t, score_col, mask_fk, *, is_last, p_block=None):
    """data: [P, F, E]; w_t: [E, O] (= torch weight.T); score_col: [O, 1]; mask_fk: [F, K]."""
    P, F, E = data.shape
    O = w_t.shape[1]
    K = mask_fk.shape[1]

    p_block, p_pad, nsteps = _plan_p_blocks(P, p_block)
    assert nsteps == 1 or p_block % 8 == 0, "multi-step grids need sublane-aligned blocks"

    # Fold the score projection into the weights as one extra output column:
    #   s = (x @ W^T) . score == x @ (W^T score^T)
    w_aug = jnp.concatenate([w_t, w_t @ score_col], axis=1)       # [E, O+1]

    # Flatten data to 2-D [P*F, E] (free reshape): one contiguous DMA per block and the
    # MXU is fed with zero in-kernel relayout.  Pad P if the plan requires it (zeros are
    # harmless: masked softmax of zero scores is finite; padded rows are sliced off).
    if p_pad != P:
        data = jnp.pad(data, ((0, p_pad - P), (0, 0), (0, 0)))
    data_2d = data.reshape(p_pad * F, E)

    cparams = pltpu.CompilerParams(dimension_semantics=("parallel",))
    data_spec = pl.BlockSpec((p_block * F, E), lambda i: (i, 0))
    w_spec = pl.BlockSpec((E, O + 1), lambda i: (0, 0))           # resident weights

    if is_last:
        out2d = pl.pallas_call(
            _hat_kernel_last,
            out_shape=jax.ShapeDtypeStruct((p_pad * F, O), jnp.float32),
            grid=(nsteps,),
            in_specs=[data_spec, w_spec,
                      pl.BlockSpec((1, F), lambda i: (0, 0))],
            out_specs=pl.BlockSpec((p_block * F, O), lambda i: (i, 0)),
            compiler_params=cparams,
        )(data_2d, w_aug, mask_fk[:, 0][None, :])
        # torch: after_softmax_tensor.view(-1, all_dims * out_features); reshaping the
        # matmul-native [P*F, O] slab to (P, F*O) is free (same row-major order).
        return out2d[: P * F].reshape(P, F * O)

    out = pl.pallas_call(
        _hat_kernel_not_last,
        out_shape=jax.ShapeDtypeStruct((p_pad, K * O), jnp.float32),
        grid=(nsteps,),
        in_specs=[data_spec, w_spec,
                  pl.BlockSpec((F, K), lambda i: (0, 0))],
        out_specs=pl.BlockSpec((p_block, K * O), lambda i: (i, 0)),
        compiler_params=cparams,
    )(data_2d, w_aug, mask_fk)
    # torch: cat(per-layer sums over dim=1, dim=1) -> [P, K, O]
    return out[:P].reshape(P, K, O)


# ---------------------------------------------------------------------------
# Pure-JAX reference (mirrors the torch forward; high-precision matmuls)
# ---------------------------------------------------------------------------
def hat_layer_ref(data, w_t, score_col, mask_fk, *, is_last):
    hp = lax.Precision.HIGHEST
    lin = jnp.einsum("pfe,eo->pfo", data, w_t, precision=hp)      # Linear (no bias)
    s = jnp.sum(lin * score_col[:, 0][None, None, :], axis=-1, keepdims=True)
    a = jnp.where(s >= 0, s, 0.2 * s)                             # LeakyReLU(0.2)
    K = mask_fk.shape[1]
    outs = []
    for k in range(K):
        m = mask_fk[:, k][None, :, None]                          # [1, F, 1]
        masked = jnp.where(m > 0, a, -1e30)
        mx = jnp.max(masked, axis=1, keepdims=True)
        e = jnp.exp(masked - mx) * m
        sm = e / jnp.maximum(jnp.sum(e, axis=1, keepdims=True), 1e-30)
        after = lin * sm
        if is_last:
            return after.reshape(data.shape[0], -1)
        outs.append(jnp.sum(after, axis=1, keepdims=True))
    return jnp.concatenate(outs, axis=1)


# ---------------------------------------------------------------------------
# Main
# ---------------------------------------------------------------------------
if __name__ == "__main__":
    F, E, O = 4, 32, 16                    # all_dims, in_features, out_features
    softmax_dims = [[0, 1], [1, 2, 3]]     # feature subsets for the parallel softmax layers
    K = len(softmax_dims)

    mask_np = np.zeros((F, K), np.float32)
    for k, dims in enumerate(softmax_dims):
        mask_np[np.asarray(dims), k] = 1.0
    mask_fk = jnp.asarray(mask_np)

    def make_inputs(P, seed):
        key = jax.random.fold_in(jax.random.PRNGKey(0), seed)
        k1, k2, k3 = jax.random.split(key, 3)
        # kaiming_uniform_(a=0.2): U(-b, b), b = sqrt(6 / ((1 + a^2) * fan_in))
        a_slope = 0.2
        bw = float(np.sqrt(6.0 / ((1.0 + a_slope ** 2) * E)))
        W = jax.random.uniform(k1, (O, E), jnp.float32, -bw, bw)   # nn.Linear weight [out, in]
        bs = float(np.sqrt(6.0 / ((1.0 + a_slope ** 2) * O)))
        score = jax.random.uniform(k2, (1, O), jnp.float32, -bs, bs)
        data = jax.random.normal(k3, (P, F, E), jnp.float32)
        return data, W.T, score.T                                  # w_t:[E,O], score_col:[O,1]

    # Exact softmax divide now (no approx reciprocal); remaining slack only covers f32
    # MXU pass/summation-order differences vs the HIGHEST-precision XLA reference.
    RTOL = ATOL = 2e-3

    configs = [
        (8, 0, None),    # small P: one block (v5e/v6e) or two padded blocks (v7x)
        (32, 1, None),   # larger P: still one block on single-TC chips
        (32, 2, 16),     # forced 2-step "parallel" grid: exercises the blocked path
    ]
    for P, seed, p_blk in configs:
        data, w_t, score_col = make_inputs(P, seed)

        out_mid = hat_layer_forward(data, w_t, score_col, mask_fk,
                                    is_last=False, p_block=p_blk)
        out_last = hat_layer_forward(data, w_t, score_col, mask_fk,
                                     is_last=True, p_block=p_blk)
        jax.block_until_ready((out_mid, out_last))

        ref_mid = hat_layer_ref(data, w_t, score_col, mask_fk, is_last=False)
        ref_last = hat_layer_ref(data, w_t, score_col, mask_fk, is_last=True)

        assert out_mid.shape == (P, K, O)
        assert out_last.shape == (P, F * O)
        np.testing.assert_allclose(np.asarray(out_mid), np.asarray(ref_mid),
                                   rtol=RTOL, atol=ATOL)
        np.testing.assert_allclose(np.asarray(out_last), np.asarray(ref_last),
                                   rtol=RTOL, atol=ATOL)

    print("KERNEL_OK")
</pallas_src>

<mosaic_0001>
module attributes {stable_mosaic.version = 11 : i64} {
  func.func @_hat_kernel_not_last(%arg0: i32, %arg1: memref<32x32xf32, #tpu.memory_space<vmem>>, %arg2: memref<32x17xf32, #tpu.memory_space<vmem>>, %arg3: memref<4x2xf32, #tpu.memory_space<vmem>>, %arg4: memref<8x32xf32, #tpu.memory_space<vmem>>) attributes {dimension_semantics = [#tpu.dimension_semantics<parallel>], iteration_bounds = array<i64: 1>, scalar_prefetch = 0 : i64, scratch_operands = 0 : i64, tpu.core_type = #tpu.core_type<tc>, window_params = [{transform_indices = @transform_0, window_bounds = array<i64: 32, 32>}, {pipeline_mode = #tpu.pipeline_mode<synchronous>, transform_indices = @transform_1, window_bounds = array<i64: 32, 17>}, {pipeline_mode = #tpu.pipeline_mode<synchronous>, transform_indices = @transform_2, window_bounds = array<i64: 4, 2>}, {transform_indices = @transform_3, window_bounds = array<i64: 8, 32>}]} {
    %c0 = arith.constant 0 : index
    %c0_0 = arith.constant 0 : index
    %0 = vector.load %arg1[%c0, %c0_0] : memref<32x32xf32, #tpu.memory_space<vmem>>, vector<32x32xf32>
    %c0_1 = arith.constant 0 : index
    %c0_2 = arith.constant 0 : index
    %1 = vector.load %arg2[%c0_1, %c0_2] : memref<32x17xf32, #tpu.memory_space<vmem>>, vector<32x17xf32>
    %cst = arith.constant dense<0.000000e+00> : vector<32x17xf32>
    %2 = tpu.matmul %0, %1, %cst {dimension_numbers = #tpu.dot_dimension_numbers<[1], [0], [0], [1], [0, 0, 1, 1], [], []>} : vector<32x32xf32>, vector<32x17xf32>, vector<32x17xf32> -> vector<32x17xf32>
    %3 = vector.extract_strided_slice %2 {offsets = [0, 0], sizes = [32, 16], strides = [1, 1]} : vector<32x17xf32> to vector<32x16xf32>
    %4 = vector.extract_strided_slice %2 {offsets = [0, 16], sizes = [32, 1], strides = [1, 1]} : vector<32x17xf32> to vector<32x1xf32>
    %cst_3 = arith.constant 0.000000e+00 : f32
    %5 = vector.broadcast %cst_3 : f32 to vector<32x1xf32>
    %6 = arith.cmpf oge, %4, %5 : vector<32x1xf32>
    %cst_4 = arith.constant 2.000000e-01 : f32
    %7 = vector.broadcast %cst_4 : f32 to vector<32x1xf32>
    %8 = arith.mulf %7, %4 : vector<32x1xf32>
    %9 = arith.select %6, %4, %8 : vector<32x1xi1>, vector<32x1xf32>
    %10 = vector.shape_cast %9 : vector<32x1xf32> to vector<8x4x1xf32>
    %c0_5 = arith.constant 0 : index
    %c0_6 = arith.constant 0 : index
    %11 = vector.load %arg3[%c0_5, %c0_6] : memref<4x2xf32, #tpu.memory_space<vmem>>, vector<4x2xf32>
    %12 = vector.shape_cast %11 : vector<4x2xf32> to vector<1x4x2xf32>
    %cst_7 = arith.constant 0.000000e+00 : f32
    %13 = vector.broadcast %cst_7 : f32 to vector<1x4x2xf32>
    %14 = arith.cmpf ogt, %12, %13 : vector<1x4x2xf32>
    %cst_8 = arith.constant -1.000000e+30 : f32
    %15 = vector.shape_cast %14 : vector<1x4x2xi1> to vector<1x4x2xi1>
    %16 = vector.broadcast %15 : vector<1x4x2xi1> to vector<8x4x2xi1>
    %17 = vector.shape_cast %10 : vector<8x4x1xf32> to vector<8x4x1xf32>
    %18 = vector.broadcast %17 : vector<8x4x1xf32> to vector<8x4x2xf32>
    %19 = vector.broadcast %cst_8 : f32 to vector<8x4x2xf32>
    %20 = arith.select %16, %18, %19 : vector<8x4x2xi1>, vector<8x4x2xf32>
    %cst_9 = arith.constant dense<0xFF800000> : vector<8x2xf32>
    %21 = vector.multi_reduction <maximumf>, %20, %cst_9 [1] : vector<8x4x2xf32> to vector<8x2xf32>
    %22 = vector.shape_cast %21 : vector<8x2xf32> to vector<8x1x2xf32>
    %23 = vector.broadcast %22 : vector<8x1x2xf32> to vector<8x4x2xf32>
    %24 = arith.subf %20, %23 : vector<8x4x2xf32>
    %25 = math.exp %24 : vector<8x4x2xf32>
    %26 = vector.broadcast %12 : vector<1x4x2xf32> to vector<8x4x2xf32>
    %27 = arith.mulf %25, %26 : vector<8x4x2xf32>
    %cst_10 = arith.constant dense<0.000000e+00> : vector<8x2xf32>
    %28 = vector.multi_reduction <add>, %27, %cst_10 [1] : vector<8x4x2xf32> to vector<8x2xf32>
    %29 = vector.shape_cast %28 : vector<8x2xf32> to vector<8x1x2xf32>
    %cst_11 = arith.constant 1.000000e-30 : f32
    %30 = vector.broadcast %cst_11 : f32 to vector<8x1x2xf32>
    %31 = arith.maximumf %29, %30 : vector<8x1x2xf32>
    %32 = vector.broadcast %31 : vector<8x1x2xf32> to vector<8x4x2xf32>
    %33 = arith.divf %27, %32 : vector<8x4x2xf32>
    %34 = vector.shape_cast %3 : vector<32x16xf32> to vector<8x4x16xf32>
    %35 = vector.extract_strided_slice %33 {offsets = [0, 0, 0], sizes = [8, 4, 1], strides = [1, 1, 1]} : vector<8x4x2xf32> to vector<8x4x1xf32>
    %36 = vector.broadcast %35 : vector<8x4x1xf32> to vector<8x4x16xf32>
    %37 = arith.mulf %34, %36 : vector<8x4x16xf32>
    %cst_12 = arith.constant dense<0.000000e+00> : vector<8x16xf32>
    %38 = vector.multi_reduction <add>, %37, %cst_12 [1] : vector<8x4x16xf32> to vector<8x16xf32>
    %c0_13 = arith.constant 0 : index
    %c0_14 = arith.constant 0 : index
    %39 = vector.load %arg4[%c0_13, %c0_14] : memref<8x32xf32, #tpu.memory_space<vmem>>, vector<8x16xf32>
    tpu.vector_store %arg4[%c0_13, %c0_14], %38 {strides = array<i32>} : memref<8x32xf32, #tpu.memory_space<vmem>>, vector<8x16xf32>,
    %40 = vector.extract_strided_slice %33 {offsets = [0, 0, 1], sizes = [8, 4, 1], strides = [1, 1, 1]} : vector<8x4x2xf32> to vector<8x4x1xf32>
    %41 = vector.broadcast %40 : vector<8x4x1xf32> to vector<8x4x16xf32>
    %42 = arith.mulf %34, %41 : vector<8x4x16xf32>
    %cst_15 = arith.constant dense<0.000000e+00> : vector<8x16xf32>
    %43 = vector.multi_reduction <add>, %42, %cst_15 [1] : vector<8x4x16xf32> to vector<8x16xf32>
    %c0_16 = arith.constant 0 : index
    %c16 = arith.constant 16 : index
    %44 = vector.load %arg4[%c0_16, %c16] : memref<8x32xf32, #tpu.memory_space<vmem>>, vector<8x16xf32>
    tpu.vector_store %arg4[%c0_16, %c16], %43 {strides = array<i32>} : memref<8x32xf32, #tpu.memory_space<vmem>>, vector<8x16xf32>,
    return
  }
  func.func @transform_0(%arg0: i32) -> (i32, i32) {
    %c0_i32 = arith.constant 0 : i32
    %c0_i32_0 = arith.constant 0 : i32
    return %arg0, %c0_i32 : i32, i32
  }
  func.func @transform_1(%arg0: i32) -> (i32, i32) {
    %c0_i32 = arith.constant 0 : i32
    %c0_i32_0 = arith.constant 0 : i32
    %c0_i32_1 = arith.constant 0 : i32
    return %c0_i32, %c0_i32_0 : i32, i32
  }
  func.func @transform_2(%arg0: i32) -> (i32, i32) {
    %c0_i32 = arith.constant 0 : i32
    %c0_i32_0 = arith.constant 0 : i32
    %c0_i32_1 = arith.constant 0 : i32
    return %c0_i32, %c0_i32_0 : i32, i32
  }
  func.func @transform_3(%arg0: i32) -> (i32, i32) {
    %c0_i32 = arith.constant 0 : i32
    %c0_i32_0 = arith.constant 0 : i32
    return %arg0, %c0_i32 : i32, i32
  }
}

</mosaic_0001>

<bundles_post_ra>
// kernel: tpu_custom_call.1
= control target key start
LH: loop header
LB: loop body
LE: loop exit
PB: predicated region body
PF: predicated region fallthrough
CT: control target
= control target key end

     0   :  { %s995_s0 = inlined_call_operand.vmem [shape: f32[32,32], index: 0, kind: input, shape index: {}]   ;;  %s996_s1 = inlined_call_operand.vmem [shape: f32[32,17], index: 1, kind: input, shape index: {}]   ;;  %s997_s2 = inlined_call_operand.vmem [shape: f32[4,2], index: 2, kind: input, shape index: {}]   ;;  %s998_s3 = inlined_call_operand.hbm [shape: f32[8,32], index: 3, kind: output, shape index: {}]  }
   0x1   :  { %v22_v0 = vld [vmem:[%s996_s1 + $0x18] sm:$0xff]  ;;  %v21_v1 = vld [vmem:[%s996_s1 + $0x10] sm:$0xff]  ;;  %v20_v2 = vld [vmem:[%s996_s1 + $0x8] sm:$0xff] }
   0x2   :  { %694 = vmatprep.subr.mxu0 %v22_v0  ;;  %708 = vmatprep.subr.mxu1 %v22_v0 }
   0x3   :  { %695 = vmatpush3.msra.mxu0 %v22_v0  ;;  %712 = vmatpush3.msra.mxu1 %v22_v0 }
   0x4   :  { %8 = vsyncpa [#allocation3], 0  ;;  %696 = vmatprep.subr.mxu0 %v21_v1  ;;  %709 = vmatprep.subr.mxu1 %v21_v1  ;;  %v15_v3 = vld [vmem:[%s995_s0] sm:$0xff]  ;;  %vm23_vm0 = vcmask 261120   ;;  %v16_v5 = vld [vmem:[%s995_s0 + $0x8] sm:$0xff]  ;;  %v783_v8 = vmov 16   ;;  %v152_v28 = vlaneseq }
   0x5   :  { %697 = vmatpush3.msra.mxu0 %v21_v1  ;;  %713 = vmatpush3.msra.mxu1 %v21_v1  ;;  %v19_v4 = vld [vmem:[%s996_s1] sm:$0xff]  ;;  %v17_v6 = vld [vmem:[%s995_s0 + $0x10] sm:$0xff]  ;;  %v18_v7 = vld [vmem:[%s995_s0 + $0x18] sm:$0xff]  ;;  %v784_v25 = vmov 1   ;;  %v785_v26 = vmov 839922192  }
   0x6   :  { %698 = vmatprep.subr.mxu0 %v20_v2  ;;  %710 = vmatprep.subr.mxu1 %v20_v2  ;;  %v150_v27 = vunpack.c.l.s4 %v785_v26  ;;  %v153_v30 = vshrl.u32 %v152_v28, 7  ;;  %v862_v31 = vld [vmem:[%s997_s2] sm:$0xf]  ;;  %vm241_vm6 = vcmask 11264   ;;  %vm470_vm7 = vcmask 125952   ;;  %s787_s2 = smov 16  }
   0x7   :  { %699 = vmatpush3.msra.mxu0 %v20_v2  ;;  %702 = vmatprep.mubr.msk.f32.mxu0 %vm23_vm0, %v15_v3  ;;  %vm142_vm5 = vcmp.gt.f32.partialorder %v862_v31, 0.0  ;;  %vm535_vm8 = vcmask 1041409   ;;  %vm537_vm9 = vcmask 1042434   ;;  %vm539_vm10 = vcmask 1043459   ;;  %s788_s28 = smov [#allocation2]  }
   0x8   :  { %700 = vmatprep.subr.mxu0 %v19_v4  ;;  %714 = vmatpush3.msra.mxu1 %v20_v2  ;;  %v151_v29 = vunpack.c.0.s8 %v150_v27  ;;  %vm541_vm11 = vcmask 1044484   ;;  %vm543_vm12 = vcmask 1045509   ;;  %vm545_vm13 = vcmask 1046534   ;;  %s674_s29 = sshll.u32 %s788_s28, 4  ;;  %s675_s29 = int_to_ptr.vmem [resolvable:$true] %s674_s29 }
   0x9   :  { %701 = vmatpush3.msra.mxu0 %v19_v4  ;;  %711 = vmatprep.subr.mxu1 %v19_v4  ;;  %vm547_vm14 = vcmask 1047559   ;;  %vm550_vm15 = vcmask 130048   ;;  %s761_s30 = scalar_lea.vmem %s675_s29, 128  ;;  %p766_p1 = scmp.lt.s32.totalorder %s675_s29, %s675_s29 }
   0xa   :  { %703 = vmatmul.mubr.msk.f32.vlgmr.msra.gmra.mxu0 %vm23_vm0, %v16_v5  ;;  %715 = vmatpush3.msra.mxu1 %v19_v4  ;;  %v154_v32 = vsub.s32 %v151_v29, %v153_v30  ;;  %p762_p0 = scmp.ne.s32.totalorder %s675_s29, %s761_s30  ;;  %p767_p2 = scmp.lt.s32.totalorder %s761_s30, %s761_s30 }
   0xb   :  { %705 = vmatprep.mubr.msk.f32.mxu1 %vm23_vm0, %v17_v6  ;;  %722 = vset.pattern.permute.xlu1 %v783_v8 }
   0xc   :  { %706 = vmatmul.mubr.msk.f32.vlgmr.msra.gmra.mxu1 %vm23_vm0, %v18_v7  ;;  %723 = vset.pattern.permute.xlu0 %v783_v8  ;;  %vm666_vm0 = vcmask 261248   ;;  %p768_p3 = por %p767_p2, %p766_p1 }
   0xe   :  { %p769_p4 = pnand %p768_p3, %p762_p0 }
  0xca   :  { %v837_v9 = vpop.f32.mrf.mxu0 }
  0xcb   :  { %vm122_vm1 = vcmp.ge.f32.partialorder %v837_v9, 0.0  ;;  %v126_v10 = vmul.f32 0.2, %v837_v9 }
  0xcc   :  { %v841_v11 = vpop.f32.mrf.mxu0  ;;  %v843_v12 = vpop.f32.mrf.mxu1 }
  0xcd   :  { %v130_v13 = vsel %vm122_vm1, %v837_v9, %v126_v10  ;;  %vm121_vm2 = vcmp.ge.f32.partialorder %v841_v11, 0.0  ;;  %v125_v14 = vmul.f32 0.2, %v841_v11  ;;  %v128_v20 = vmul.f32 0.2, %v843_v12 }
  0xce   :  { %168 = vperm.xlu1 %722, %v130_v13   ;;  %v848_v15 = vpop.f32.mrf.mxu1  ;;  %v138_v18 = vcombine.high %v130_v13, %v130_v13  ;;  %vm124_vm4 = vcmp.ge.f32.partialorder %v843_v12, 0.0 }
  0xcf   :  { %v127_v16 = vmul.f32 0.2, %v848_v15  ;;  %v129_v17 = vsel %vm121_vm2, %v841_v11, %v125_v14  ;;  %vm123_vm3 = vcmp.ge.f32.partialorder %v848_v15, 0.0  ;;  %v132_v23 = vsel %vm124_vm4, %v843_v12, %v128_v20 }
  0xd0   :  { %146 = vperm.xlu0 %723, %v129_v17   ;;  %v137_v21 = vcombine.high %v129_v17, %v129_v17  ;;  %v140_v24 = vcombine.high %v132_v23, %v132_v23 }
  0xd1   :  { %v131_v19 = vsel %vm123_vm3, %v848_v15, %v127_v16 }
  0xd2   :  { %179 = vperm.xlu1 %722, %v138_v18   ;;  %v139_v22 = vcombine.high %v131_v19, %v131_v19 }
  0xd4   :  { %157 = vperm.xlu0 %723, %v137_v21  }
  0xd6   :  { %201 = vperm.xlu1 %722, %v139_v22  }
  0xd8   :  { %190 = vperm.xlu0 %723, %v131_v19  }
  0xda   :  { %223 = vperm.xlu1 %722, %v140_v24  }
  0xdc   :  { %212 = vperm.xlu0 %723, %v132_v23  }
  0xde   :  { %724 = vset.pattern.permute.xlu1 %v784_v25 }
  0xe0   :  { %725 = vset.pattern.permute.xlu0 %v784_v25 }
 0x149   :  { %v169_v33 = vpop.permute.xlu1 %168 }
 0x14a   :  { %v177_v34 = vrot.slane %v169_v33, %v154_v32 }
 0x14b   :  { %v147_v35 = vpop.permute.xlu0 %146 }
 0x14c   :  { %v235_v36 = vsel %vm142_vm5, %v177_v34, -1e+30  ;;  %v155_v37 = vrot.slane %v147_v35, %v154_v32 }
 0x14d   :  { %v256_v38 = vsel %vm241_vm6, %v235_v36, -inf  ;;  %v180_v39 = vpop.permute.xlu1 %179 }
 0x14e   :  { %v257_v40 = vrot.slane %v256_v38, 4  ;;  %v233_v41 = vsel %vm142_vm5, %v155_v37, -1e+30  ;;  %v188_v42 = vrot.slane %v180_v39, %v154_v32 }
 0x14f   :  { %v242_v43 = vsel %vm241_vm6, %v233_v41, -inf  ;;  %v158_v44 = vpop.permute.xlu0 %157 }
 0x150   :  { %v258_v45 = vmax.f32 %v256_v38, %v257_v40  ;;  %v243_v46 = vrot.slane %v242_v43, 4  ;;  %v236_v47 = vsel %vm142_vm5, %v188_v42, -1e+30  ;;  %v166_v48 = vrot.slane %v158_v44, %v154_v32 }
 0x151   :  { %v263_v49 = vsel %vm241_vm6, %v236_v47, -inf  ;;  %v202_v50 = vpop.permute.xlu1 %201 }
 0x152   :  { %v259_v51 = vrot.slane %v258_v45, 2  ;;  %v244_v52 = vmax.f32 %v242_v43, %v243_v46  ;;  %v264_v53 = vrot.slane %v263_v49, 4  ;;  %v234_v54 = vsel %vm142_vm5, %v166_v48, -1e+30 }
 0x153   :  { %v249_v55 = vsel %vm241_vm6, %v234_v54, -inf  ;;  %v210_v56 = vrot.slane %v202_v50, %v154_v32  ;;  %v191_v57 = vpop.permute.xlu0 %190 }
 0x154   :  { %v260_v58 = vmax.f32 %v258_v45, %v259_v51  ;;  %v245_v59 = vrot.slane %v244_v52, 2  ;;  %v265_v60 = vmax.f32 %v263_v49, %v264_v53  ;;  %v250_v61 = vrot.slane %v249_v55, 4 }
 0x155   :  { %v238_v62 = vsel %vm142_vm5, %v210_v56, -1e+30  ;;  %v199_v63 = vrot.slane %v191_v57, %v154_v32  ;;  %v224_v0 = vpop.permute.xlu1 %223 }
 0x156   :  { %v261_v1 = vrot.slane %v260_v58, 1  ;;  %v246_v2 = vmax.f32 %v244_v52, %v245_v59  ;;  %v266_v3 = vrot.slane %v265_v60, 2  ;;  %v251_v4 = vmax.f32 %v249_v55, %v250_v61 }
 0x157   :  { %v277_v5 = vsel %vm241_vm6, %v238_v62, -inf  ;;  %v237_v6 = vsel %vm142_vm5, %v199_v63, -1e+30  ;;  %v232_v7 = vrot.slane %v224_v0, %v154_v32  ;;  %v213_v8 = vpop.permute.xlu0 %212 }
 0x158   :  { %v262_v10 = vmax.f32 %v260_v58, %v261_v1  ;;  %v247_v13 = vrot.slane %v246_v2, 1  ;;  %v267_v14 = vmax.f32 %v265_v60, %v266_v3  ;;  %v252_v16 = vrot.slane %v251_v4, 2 }
 0x159   :  { %v278_v17 = vrot.slane %v277_v5, 4  ;;  %v270_v18 = vsel %vm241_vm6, %v237_v6, -inf  ;;  %v240_v19 = vsel %vm142_vm5, %v232_v7, -1e+30  ;;  %v221_v20 = vrot.slane %v213_v8, %v154_v32 }
 0x15a   :  { %v300_v21 = vsub.f32 %v235_v36, %v262_v10  ;;  %v248_v22 = vmax.f32 %v246_v2, %v247_v13  ;;  %v268_v23 = vrot.slane %v267_v14, 1  ;;  %v253_v24 = vmax.f32 %v251_v4, %v252_v16 }
 0x15b   :  { %v279_v26 = vmax.f32 %v277_v5, %v278_v17  ;;  %v271_v27 = vrot.slane %v270_v18, 4  ;;  %v291_v28 = vsel %vm241_vm6, %v240_v19, -inf  ;;  %v239_v29 = vsel %vm142_vm5, %v221_v20, -1e+30 }
 0x15c   :  { %v310_v30 = vmul.f32 1.442695, %v300_v21  ;;  %v298_v33 = vsub.f32 %v233_v41, %v248_v22  ;;  %v269_v34 = vmax.f32 %v267_v14, %v268_v23  ;;  %v254_v35 = vrot.slane %v253_v24, 1 }
 0x15d   :  { %v280_v37 = vrot.slane %v279_v26, 2  ;;  %v272_v38 = vmax.f32 %v270_v18, %v271_v27  ;;  %v292_v39 = vrot.slane %v291_v28, 4  ;;  %v284_v32 = vsel %vm241_vm6, %v239_v29, -inf }
 0x15e   :  { %729 = vpow2.f32 %v310_v30  ;;  %v306_v36 = vmul.f32 1.442695, %v298_v33  ;;  %v301_v40 = vsub.f32 %v236_v47, %v269_v34  ;;  %v255_v42 = vmax.f32 %v253_v24, %v254_v35 }
 0x15f   :  { %v281_v43 = vmax.f32 %v279_v26, %v280_v37  ;;  %v273_v44 = vrot.slane %v272_v38, 2  ;;  %v293_v45 = vmax.f32 %v291_v28, %v292_v39  ;;  %v285_v46 = vrot.slane %v284_v32, 4 }
 0x160   :  { %731 = vpow2.f32 %v306_v36  ;;  %v312_v48 = vmul.f32 1.442695, %v301_v40  ;;  %v299_v49 = vsub.f32 %v234_v54, %v255_v42 }
 0x161   :  { %v282_v50 = vrot.slane %v281_v43, 1  ;;  %v274_v41 = vmax.f32 %v272_v38, %v273_v44  ;;  %v294_v51 = vrot.slane %v293_v45, 2  ;;  %v286_v52 = vmax.f32 %v284_v32, %v285_v46 }
 0x162   :  { %733 = vpow2.f32 %v312_v48  ;;  %v308_v53 = vmul.f32 1.442695, %v299_v49 }
 0x163   :  { %v283_v55 = vmax.f32 %v281_v43, %v282_v50  ;;  %v275_v56 = vrot.slane %v274_v41, 1  ;;  %v295_v57 = vmax.f32 %v293_v45, %v294_v51  ;;  %v287_v58 = vrot.slane %v286_v52, 2 }
 0x164   :  { %735 = vpow2.f32 %v308_v53 }
 0x165   :  { %v303_v47 = vsub.f32 %v238_v62, %v283_v55  ;;  %v276_v59 = vmax.f32 %v274_v41, %v275_v56  ;;  %v296_v60 = vrot.slane %v295_v57, 1  ;;  %v288_v61 = vmax.f32 %v286_v52, %v287_v58 }
 0x167   :  { %v316_v63 = vmul.f32 1.442695, %v303_v47  ;;  %v302_v0 = vsub.f32 %v237_v6, %v276_v59  ;;  %v297_v1 = vmax.f32 %v295_v57, %v296_v60  ;;  %v289_v2 = vrot.slane %v288_v61, 1 }
 0x169   :  { %737 = vpow2.f32 %v316_v63  ;;  %v314_v54 = vmul.f32 1.442695, %v302_v0  ;;  %v305_v3 = vsub.f32 %v240_v19, %v297_v1  ;;  %v290_v4 = vmax.f32 %v288_v61, %v289_v2 }
 0x16b   :  { %v730_v5 = vpop.eup %729  ;;  %739 = vpow2.f32 %v314_v54  ;;  %v320_v7 = vmul.f32 1.442695, %v305_v3  ;;  %v304_v8 = vsub.f32 %v239_v29, %v290_v4 }
 0x16c   :  { %v890_v10 = vmul.f32 %v730_v5, %v862_v31 }
 0x16d   :  { %v732_v13 = vpop.eup %731  ;;  %741 = vpow2.f32 %v320_v7  ;;  %v318_v62 = vmul.f32 1.442695, %v304_v8 }
 0x16e   :  { %v344_v14 = vsel %vm241_vm6, %v890_v10, 0.0  ;;  %v895_v6 = vmul.f32 %v732_v13, %v862_v31 }
 0x16f   :  { %v734_v16 = vpop.eup %733  ;;  %743 = vpow2.f32 %v318_v62  ;;  %v345_v17 = vrot.slane %v344_v14, 4 }
 0x170   :  { %v330_v18 = vsel %vm241_vm6, %v895_v6, 0.0  ;;  %v900_v19 = vmul.f32 %v734_v16, %v862_v31 }
 0x171   :  { %v736_v20 = vpop.eup %735  ;;  %v346_v21 = vadd.f32 %v345_v17, %v344_v14  ;;  %v331_v22 = vrot.slane %v330_v18, 4 }
 0x172   :  { %v351_v23 = vsel %vm241_vm6, %v900_v19, 0.0  ;;  %v905_v24 = vmul.f32 %v736_v20, %v862_v31 }
 0x173   :  { %v347_v26 = vrot.slane %v346_v21, 2  ;;  %v332_v27 = vadd.f32 %v331_v22, %v330_v18  ;;  %v352_v28 = vrot.slane %v351_v23, 4 }
 0x174   :  { %v337_v29 = vsel %vm241_vm6, %v905_v24, 0.0 }
 0x175   :  { %v348_v30 = vadd.f32 %v347_v26, %v346_v21  ;;  %v333_v33 = vrot.slane %v332_v27, 2  ;;  %v353_v34 = vadd.f32 %v352_v28, %v351_v23  ;;  %v338_v35 = vrot.slane %v337_v29, 4 }
 0x176   :  { %v738_v37 = vpop.eup %737 }
 0x177   :  { %v349_v38 = vrot.slane %v348_v30, 1  ;;  %v334_v39 = vadd.f32 %v333_v33, %v332_v27  ;;  %v354_v32 = vrot.slane %v353_v34, 2  ;;  %v339_v36 = vadd.f32 %v338_v35, %v337_v29 }
 0x178   :  { %v740_v40 = vpop.eup %739  ;;  %v910_v42 = vmul.f32 %v738_v37, %v862_v31 }
 0x179   :  { %v350_v43 = vadd.f32 %v349_v38, %v348_v30  ;;  %v335_v44 = vrot.slane %v334_v39, 1  ;;  %v355_v45 = vadd.f32 %v354_v32, %v353_v34  ;;  %v340_v46 = vrot.slane %v339_v36, 2 }
 0x17a   :  { %v742_v48 = vpop.eup %741  ;;  %v365_v49 = vsel %vm241_vm6, %v910_v42, 0.0  ;;  %v915_v50 = vmul.f32 %v740_v40, %v862_v31 }
 0x17b   :  { %v388_v41 = vmax.f32 %v350_v43, 1e-30  ;;  %v336_v51 = vadd.f32 %v335_v44, %v334_v39  ;;  %v356_v52 = vrot.slane %v355_v45, 1  ;;  %v341_v53 = vadd.f32 %v340_v46, %v339_v36 }
 0x17c   :  { %v744_v55 = vpop.eup %743  ;;  %v366_v56 = vrot.slane %v365_v49, 4  ;;  %v358_v57 = vsel %vm241_vm6, %v915_v50, 0.0  ;;  %v920_v58 = vmul.f32 %v742_v48, %v862_v31 }
 0x17d   :  { %745 = vrcp.f32 %v388_v41  ;;  %v386_v47 = vmax.f32 %v336_v51, 1e-30  ;;  %v357_v59 = vadd.f32 %v356_v52, %v355_v45  ;;  %v342_v60 = vrot.slane %v341_v53, 1 }
 0x17e   :  { %v367_v61 = vadd.f32 %v366_v56, %v365_v49  ;;  %v359_v63 = vrot.slane %v358_v57, 4  ;;  %v379_v0 = vsel %vm241_vm6, %v920_v58, 0.0  ;;  %v328_v1 = vmul.f32 %v744_v55, %v862_v31 }
 0x17f   :  { %747 = vrcp.f32 %v386_v47  ;;  %v389_v2 = vmax.f32 %v357_v59, 1e-30  ;;  %v343_v54 = vadd.f32 %v342_v60, %v341_v53  ;;  %v380_v3 = vrot.slane %v379_v0, 4 }
 0x180   :  { %v368_v4 = vrot.slane %v367_v61, 2  ;;  %v360_v5 = vadd.f32 %v359_v63, %v358_v57  ;;  %v372_v7 = vsel %vm241_vm6, %v328_v1, 0.0  ;;  %v414_v59 = vcombine.high %v841_v11, %v841_v11 }
 0x181   :  { %749 = vrcp.f32 %v389_v2  ;;  %v387_v8 = vmax.f32 %v343_v54, 1e-30  ;;  %v381_v13 = vadd.f32 %v380_v3, %v379_v0  ;;  %v373_v62 = vrot.slane %v372_v7, 4 }
 0x182   :  { %v369_v14 = vadd.f32 %v368_v4, %v367_v61  ;;  %v361_v16 = vrot.slane %v360_v5, 2 }
 0x183   :  { %751 = vrcp.f32 %v387_v8  ;;  %v382_v17 = vrot.slane %v381_v13, 2  ;;  %v374_v18 = vadd.f32 %v373_v62, %v372_v7 }
 0x184   :  { %v370_v20 = vrot.slane %v369_v14, 1  ;;  %v362_v21 = vadd.f32 %v361_v16, %v360_v5 }
 0x185   :  { %v383_v31 = vadd.f32 %v382_v17, %v381_v13  ;;  %v375_v22 = vrot.slane %v374_v18, 2  ;;  %v949_v17 = vcombine.high %v848_v15, %v848_v15 }
 0x186   :  { %v371_v23 = vadd.f32 %v370_v20, %v369_v14  ;;  %v363_v26 = vrot.slane %v362_v21, 1 }
 0x187   :  { %v384_v27 = vrot.slane %v383_v31, 1  ;;  %v376_v28 = vadd.f32 %v375_v22, %v374_v18 }
 0x188   :  { %v391_v29 = vmax.f32 %v371_v23, 1e-30  ;;  %v364_v30 = vadd.f32 %v363_v26, %v362_v21 }
 0x189   :  { %v385_v33 = vadd.f32 %v384_v27, %v383_v31  ;;  %v377_v34 = vrot.slane %v376_v28, 1 }
 0x18a   :  { %v746_v35 = vpop.eup %745  ;;  %753 = vrcp.f32 %v391_v29  ;;  %v390_v37 = vmax.f32 %v364_v30, 1e-30  ;;  %v956_v30 = vcombine.high %v843_v12, %v843_v12 }
 0x18b   :  { %v399_v38 = vmul.f32 %v746_v35, %v890_v10  ;;  %v393_v39 = vmax.f32 %v385_v33, 1e-30  ;;  %v378_v32 = vadd.f32 %v377_v34, %v376_v28 }
 0x18c   :  { %v748_v36 = vpop.eup %747  ;;  %755 = vrcp.f32 %v390_v37 }
 0x18d   :  { %561 = vperm.xlu1 %724, %v399_v38   ;;  %v395_v40 = vmul.f32 %v748_v36, %v895_v6  ;;  %757 = vrcp.f32 %v393_v39  ;;  %v392_v43 = vmax.f32 %v378_v32, 1e-30 }
 0x18e   :  { %v750_v44 = vpop.eup %749 }
 0x18f   :  { %553 = vperm.xlu0 %725, %v395_v40   ;;  %759 = vrcp.f32 %v392_v43  ;;  %v401_v46 = vmul.f32 %v750_v44, %v900_v19  ;;  %v786_v19 = vmov 0  }
 0x190   :  { %v752_v45 = vpop.eup %751 }
 0x191   :  { %v397_v48 = vmul.f32 %v752_v45, %v905_v24 }
 0x193   :  { %565 = vperm.xlu0 %725, %v401_v46   ;;  %557 = vperm.xlu1 %724, %v397_v48  }
 0x197   :  { %v754_v10 = vpop.eup %753 }
 0x198   :  { %v405_v49 = vmul.f32 %v754_v10, %v910_v42 }
 0x199   :  { %v756_v41 = vpop.eup %755 }
 0x19a   :  { %v758_v51 = vpop.eup %757  ;;  %573 = vperm.xlu0 %725, %v405_v49   ;;  %v403_v6 = vmul.f32 %v756_v41, %v915_v50 }
 0x19b   :  { %v409_v53 = vmul.f32 %v758_v51, %v920_v58 }
 0x19c   :  { %v760_v52 = vpop.eup %759  ;;  %569 = vperm.xlu1 %724, %v403_v6  }
 0x19d   :  { %v407_v55 = vmul.f32 %v760_v52, %v328_v1 }
 0x19e   :  { %581 = vperm.xlu0 %725, %v409_v53  }
 0x1a0   :  { %577 = vperm.xlu1 %724, %v407_v55  }
 0x1a2   :  { %727 = vset.pattern.permute.xlu0 %v786_v19 }
 0x1a3   :  { %429 = vperm.xlu0 %727, %v397_v48  }
 0x1a4   :  { %726 = vset.pattern.permute.xlu1 %v786_v19 }
 0x1a5   :  { %424 = vperm.xlu1 %726, %v395_v40  }
 0x1a7   :  { %444 = vperm.xlu0 %727, %v403_v6  }
 0x1a9   :  { %434 = vperm.xlu1 %726, %v399_v38  }
 0x1ab   :  { %454 = vperm.xlu0 %727, %v407_v55  }
 0x1ad   :  { %439 = vperm.xlu1 %726, %v401_v46  }
 0x1af   :  { %728 = vset.pattern.permute.xlu0 %v784_v25  ;;  %v942_v25 = vcombine.high %v837_v9, %v837_v9 }
 0x1b1   :  { %449 = vperm.xlu1 %726, %v405_v49  }
 0x1b5   :  { %459 = vperm.xlu1 %726, %v409_v53  }
 0x208   :  { %v562_v24 = vpop.permute.xlu1 %561 }
 0x209   :  { %v586_v42 = vmul.f32 %v837_v9, %v562_v24 }
 0x20a   :  { %v554_v50 = vpop.permute.xlu0 %553 }
 0x20b   :  { %v606_v56 = vsel %vm470_vm7, %v586_v42, 0.0  ;;  %v584_v57 = vmul.f32 %v554_v50, %v841_v11 }
 0x20c   :  { %v607_v58 = vrot.slane %v606_v56, 4 }
 0x20d   :  { %v592_v47 = vsel %vm470_vm7, %v584_v57, 0.0 }
 0x20e   :  { %v593_v60 = vrot.slane %v592_v47, 4  ;;  %v558_v61 = vpop.permute.xlu1 %557  ;;  %v566_v63 = vpop.permute.xlu0 %565  ;;  %v608_v2 = vadd.f32 %v607_v58, %v606_v56 }
 0x20f   :  { %v585_v0 = vmul.f32 %v558_v61, %v414_v59  ;;  %v587_v1 = vmul.f32 %v566_v63, %v942_v25 }
 0x210   :  { %v594_v54 = vadd.f32 %v593_v60, %v592_v47  ;;  %v609_v13 = vrot.slane %v608_v2, 2 }
 0x211   :  { %v599_v3 = vsel %vm470_vm7, %v585_v0, 0.0  ;;  %v613_v4 = vsel %vm470_vm7, %v587_v1, 0.0 }
 0x212   :  { %v595_v5 = vrot.slane %v594_v54, 2  ;;  %v600_v7 = vrot.slane %v599_v3, 4  ;;  %v614_v8 = vrot.slane %v613_v4, 4  ;;  %v610_v23 = vadd.f32 %v609_v13, %v608_v2 }
 0x214   :  { %v601_v62 = vadd.f32 %v600_v7, %v599_v3  ;;  %v615_v14 = vadd.f32 %v614_v8, %v613_v4  ;;  %v596_v16 = vadd.f32 %v595_v5, %v594_v54  ;;  %v611_v40 = vrot.slane %v610_v23, 1 }
 0x215   :  { %v574_v18 = vpop.permute.xlu0 %573 }
 0x216   :  { %v602_v20 = vrot.slane %v601_v62, 2  ;;  %v616_v21 = vrot.slane %v615_v14, 2  ;;  %v589_v22 = vmul.f32 %v574_v18, %v949_v17  ;;  %v597_v28 = vrot.slane %v596_v16, 1 }
 0x217   :  { %v570_v31 = vpop.permute.xlu1 %569  ;;  %v612_v42 = vadd.f32 %v611_v40, %v610_v23 }
 0x218   :  { %v603_v26 = vadd.f32 %v602_v20, %v601_v62  ;;  %v588_v27 = vmul.f32 %v570_v31, %v848_v15  ;;  %v627_v29 = vsel %vm470_vm7, %v589_v22, 0.0  ;;  %v617_v35 = vadd.f32 %v616_v21, %v615_v14 }
 0x219   :  { %v582_v33 = vpop.permute.xlu0 %581  ;;  %v628_v38 = vrot.slane %v627_v29, 4  ;;  %v598_v46 = vadd.f32 %v597_v28, %v596_v16 }
 0x21a   :  { %v604_v34 = vrot.slane %v603_v26, 1  ;;  %v620_v37 = vsel %vm470_vm7, %v588_v27, 0.0  ;;  %v591_v36 = vmul.f32 %v582_v33, %v956_v30  ;;  %v618_v49 = vrot.slane %v617_v35, 1 }
 0x21b   :  { %v621_v39 = vrot.slane %v620_v37, 4  ;;  %v578_v32 = vpop.permute.xlu1 %577  ;;  %v629_v44 = vadd.f32 %v628_v38, %v627_v29 }
 0x21c   :  { %v605_v43 = vadd.f32 %v604_v34, %v603_v26  ;;  %v590_v45 = vmul.f32 %v843_v12, %v578_v32  ;;  %v641_v10 = vsel %vm470_vm7, %v591_v36, 0.0  ;;  %v619_v63 = vadd.f32 %v618_v49, %v617_v35 }
 0x21d   :  { %v622_v48 = vadd.f32 %v621_v39, %v620_v37  ;;  %v630_v41 = vrot.slane %v629_v44, 2  ;;  %v642_v6 = vrot.slane %v641_v10, 4 }
 0x21e   :  { %v634_v51 = vsel %vm470_vm7, %v590_v45, 0.0  ;;  %v430_v52 = vpop.permute.xlu0 %429  ;;  %v656_v53 = vsel %vm535_vm8, %v605_v43, %v598_v46 }
 0x21f   :  { %v623_v55 = vrot.slane %v622_v48, 2  ;;  %v635_v19 = vrot.slane %v634_v51, 4  ;;  %v463_v24 = vmul.f32 %v430_v52, %v414_v59  ;;  %v631_v50 = vadd.f32 %v630_v41, %v629_v44 }
 0x220   :  { %v643_v56 = vadd.f32 %v642_v6, %v641_v10  ;;  %v425_v57 = vpop.permute.xlu1 %424  ;;  %v657_v54 = vsel %vm537_vm9, %v612_v42, %v656_v53 }
 0x221   :  { %v624_v58 = vadd.f32 %v623_v55, %v622_v48  ;;  %v636_v47 = vadd.f32 %v635_v19, %v634_v51  ;;  %v462_v60 = vmul.f32 %v425_v57, %v841_v11  ;;  %v478_v61 = vsel %vm470_vm7, %v463_v24, 0.0 }
 0x222   :  { %v644_v0 = vrot.slane %v643_v56, 2  ;;  %v479_v1 = vrot.slane %v478_v61, 4  ;;  %v445_v2 = vpop.permute.xlu0 %444  ;;  %v632_v7 = vrot.slane %v631_v50, 1  ;;  %v658_v26 = vsel %vm539_vm10, %v619_v63, %v657_v54 }
 0x223   :  { %v625_v3 = vrot.slane %v624_v58, 1  ;;  %v637_v59 = vrot.slane %v636_v47, 2  ;;  %v471_v4 = vsel %vm470_vm7, %v462_v60, 0.0  ;;  %v466_v5 = vmul.f32 %v445_v2, %v848_v15 }
 0x224   :  { %v645_v8 = vadd.f32 %v644_v0, %v643_v56  ;;  %v472_v13 = vrot.slane %v471_v4, 4  ;;  %v480_v62 = vadd.f32 %v479_v1, %v478_v61  ;;  %v435_v11 = vpop.permute.xlu1 %434  ;;  %v633_v33 = vadd.f32 %v632_v7, %v631_v50 }
 0x225   :  { %v626_v14 = vadd.f32 %v625_v3, %v624_v58  ;;  %v638_v16 = vadd.f32 %v637_v59, %v636_v47  ;;  %v464_v18 = vmul.f32 %v837_v9, %v435_v11  ;;  %v499_v20 = vsel %vm470_vm7, %v466_v5, 0.0 }
 0x226   :  { %v646_v21 = vrot.slane %v645_v8, 1  ;;  %v473_v31 = vadd.f32 %v472_v13, %v471_v4  ;;  %v500_v22 = vrot.slane %v499_v20, 4  ;;  %v455_v23 = vpop.permute.xlu0 %454  ;;  %v481_v28 = vrot.slane %v480_v62, 2 }
 0x227   :  { %v639_v27 = vrot.slane %v638_v16, 1  ;;  %v485_v15 = vsel %vm470_vm7, %v464_v18, 0.0  ;;  %v468_v29 = vmul.f32 %v843_v12, %v455_v23  ;;  %v659_v36 = vsel %vm541_vm11, %v626_v14, %v658_v26 }
 0x228   :  { %v474_v34 = vrot.slane %v473_v31, 2  ;;  %v486_v35 = vrot.slane %v485_v15, 4  ;;  %v501_v37 = vadd.f32 %v500_v22, %v499_v20  ;;  %v440_v38 = vpop.permute.xlu1 %439  ;;  %v647_v43 = vadd.f32 %v646_v21, %v645_v8 }
 0x229   :  { %v640_v9 = vadd.f32 %v639_v27, %v638_v16  ;;  %v465_v39 = vmul.f32 %v440_v38, %v942_v25  ;;  %v513_v32 = vsel %vm470_vm7, %v468_v29, 0.0  ;;  %v482_v45 = vadd.f32 %v481_v28, %v480_v62 }
 0x22a   :  { %v487_v40 = vadd.f32 %v486_v35, %v485_v15  ;;  %v475_v44 = vadd.f32 %v474_v34, %v473_v31  ;;  %v514_v46 = vrot.slane %v513_v32, 4  ;;  %v502_v10 = vrot.slane %v501_v37, 2 }
 0x22b   :  { %v492_v12 = vsel %vm470_vm7, %v465_v39, 0.0  ;;  %v660_v41 = vsel %vm543_vm12, %v633_v33, %v659_v36  ;;  %v483_v24 = vrot.slane %v482_v45, 1 }
 0x22c   :  { %v488_v48 = vrot.slane %v487_v40, 2  ;;  %v450_v49 = vpop.permute.xlu1 %449  ;;  %v493_v51 = vrot.slane %v492_v12, 4  ;;  %v515_v25 = vadd.f32 %v514_v46, %v513_v32  ;;  %v661_v52 = vsel %vm545_vm13, %v640_v9, %v660_v41 }
 0x22d   :  { %v467_v6 = vmul.f32 %v450_v49, %v949_v17  ;;  %v662_v55 = vsel %vm547_vm14, %v647_v43, %v661_v52  ;;  %v476_v19 = vrot.slane %v475_v44, 1  ;;  %v503_v47 = vadd.f32 %v502_v10, %v501_v37 }
 0x22e   :  { %v489_v53 = vadd.f32 %v488_v48, %v487_v40  ;;  %v494_v42 = vadd.f32 %v493_v51, %v492_v12  ;;  %663 = vrot.lane.b32.xlu0 %v662_v55, %s787_s2  ;;  %v516_v61 = vrot.slane %v515_v25, 2  ;;  %v484_v1 = vadd.f32 %v483_v24, %v482_v45 }
 0x22f   :  { %v506_v50 = vsel %vm470_vm7, %v467_v6, 0.0  ;;  %v477_v0 = vadd.f32 %v476_v19, %v475_v44  ;;  %v504_v5 = vrot.slane %v503_v47, 1 }
 0x230   :  { %v490_v56 = vrot.slane %v489_v53, 1  ;;  %v507_v57 = vrot.slane %v506_v50, 4  ;;  %v460_v58 = vpop.permute.xlu1 %459  ;;  %v495_v60 = vrot.slane %v494_v42, 2  ;;  %v517_v8 = vadd.f32 %v516_v61, %v515_v25 }
 0x231   :  { %v469_v17 = vmul.f32 %v460_v58, %v956_v30  ;;  %v536_v11 = vsel %vm535_vm8, %v484_v1, %v477_v0  ;;  %v505_v20 = vadd.f32 %v504_v5, %v503_v47 }
 0x232   :  { %v508_v63 = vadd.f32 %v507_v57, %v506_v50  ;;  %v496_v2 = vadd.f32 %v495_v60, %v494_v42  ;;  %v491_v3 = vadd.f32 %v490_v56, %v489_v53  ;;  %v518_v31 = vrot.slane %v517_v8, 1 }
 0x233   :  { %v520_v54 = vsel %vm470_vm7, %v469_v17, 0.0 }
 0x234   :  { %v509_v59 = vrot.slane %v508_v63, 2  ;;  %v521_v4 = vrot.slane %v520_v54, 4  ;;  %v497_v7 = vrot.slane %v496_v2, 1  ;;  %v538_v16 = vsel %vm537_vm9, %v491_v3, %v536_v11 }
 0x235   :  { %v519_v15 = vadd.f32 %v518_v31, %v517_v8 }
 0x236   :  { %v510_v13 = vadd.f32 %v509_v59, %v508_v63  ;;  %v522_v62 = vadd.f32 %v521_v4, %v520_v54  ;;  %v498_v14 = vadd.f32 %v497_v7, %v496_v2 }
 0x238   :  { %v511_v30 = vrot.slane %v510_v13, 1  ;;  %v523_v18 = vrot.slane %v522_v62, 2  ;;  %v540_v21 = vsel %vm539_vm10, %v498_v14, %v538_v16 }
 0x239   :  { %v542_v26 = vsel %vm541_vm11, %v505_v20, %v540_v21 }
 0x23a   :  { %v512_v22 = vadd.f32 %v511_v30, %v510_v13  ;;  %v524_v23 = vadd.f32 %v523_v18, %v522_v62 }
 0x23c   :  { %v525_v27 = vrot.slane %v524_v23, 1  ;;  %v544_v28 = vsel %vm543_vm12, %v512_v22, %v542_v26 }
 0x23d   :  { %v546_v33 = vsel %vm545_vm13, %v519_v15, %v544_v28 }
 0x23e   :  { %v526_v29 = vadd.f32 %v525_v27, %v524_v23 }
 0x240   :  { %v548_v34 = vsel %vm547_vm14, %v526_v29, %v546_v33 }
 0x241   :  { %551 = vst.msk [vmem:[#allocation2] sm:$0xff] %vm550_vm15, %v548_v34 }
 0x2a0   :  { %v664_v35 = vpop.permute.xlu0 %663 }
 0x2a1   :  { %667 = vst.msk [vmem:[#allocation2] sm:$0xff] %vm666_vm0, %v664_v35 }
 0x2a2   :  { %772 = shalt.err (!%p769_p4)
}
 0x2a3   :  { %677 = dma.vmem_to_hbm [thread:$0]  %s675_s29, 128, %s998_s3, [#allocation3]  }
 0x2a4   :  { %781 = dma.done.wait [#allocation3], 128  }
 0x2a5   :  { %782 = vsyncadd [#allocation3], 4294967168 }
 0x2a6   :  { %681 = vsyncpa [#allocation3], 1 }

</bundles_post_ra>
